<compile_context>
chip_gen: v5e
topology: v5e:2x2
jax: 0.10.0
libtpu: 0.0.40
codegen_flags: <defaults>
</compile_context>

<pallas_src>
import functools
import math

import jax
import jax.numpy as jnp
from jax.experimental import pallas as pl
from jax.experimental.pallas import tpu as pltpu


def mha_fused_kernel(q_ref, k_ref, v_ref,
                     wq_ref, wk_ref, wv_ref,
                     bq_ref, bk_ref, bv_ref,
                     wo_ref, bo_ref,
                     out_ref,
                     *, B, S, H, d_k, operand_dtype):
    """Single-invocation fused multi-head attention.

    q_ref/k_ref/v_ref : (B*S, D)
    wq/wk/wv          : (D, H*d_k)   head-contiguous columns (scale folded in wq)
    bq/bk/bv          : (1, H*d_k)
    wo                : (H*d_k, D)   permuted so head-contiguous concat is valid
    bo                : (1, D)
    out               : (B*S, D)
    """
    f32 = jnp.float32
    dt = operand_dtype
    approx_recip = dt == jnp.bfloat16   # keep exact recip for the f32 path (1e-5 check)

    Q2 = q_ref[...].astype(dt)          # (B*S, D)
    K2 = k_ref[...].astype(dt)
    V2 = v_ref[...].astype(dt)

    # Fused projections: one (B*S, D) @ (D, H*d_k) matmul per Q/K/V on the MXU,
    # f32 accumulation. 1/sqrt(d_k) is pre-folded into wq/bq in the wrapper.
    q_all = jnp.dot(Q2, wq_ref[...].astype(dt), preferred_element_type=f32) + bq_ref[...]
    k_all = jnp.dot(K2, wk_ref[...].astype(dt), preferred_element_type=f32) + bk_ref[...]
    v_all = jnp.dot(V2, wv_ref[...].astype(dt), preferred_element_type=f32) + bv_ref[...]

    q3 = q_all.reshape(B, S, H * d_k)
    k3 = k_all.reshape(B, S, H * d_k)
    v3 = v_all.reshape(B, S, H * d_k)

    heads = []
    for h in range(H):                  # static unroll; H is small
        lo, hi = h * d_k, (h + 1) * d_k
        qh = q3[:, :, lo:hi]            # (B, S, d_k)
        kh = k3[:, :, lo:hi]
        vh = v3[:, :, lo:hi]

        scores = jnp.einsum('bqk,bsk->bqs', qh.astype(dt), kh.astype(dt),
                            preferred_element_type=f32)      # already scaled

        # torch F.softmax with dim=None on a 3-D tensor => softmax over dim 0
        # (the batch axis). Keep the softmax math in f32 on every generation
        # (v5e has no bf16 VPU/EUP path anyway).
        m = jnp.max(scores, axis=0, keepdims=True)
        e = jnp.exp(scores - m)
        denom = jnp.sum(e, axis=0, keepdims=True)
        attn = e * pl.reciprocal(denom, approx=approx_recip)

        heads.append(jnp.einsum('bqs,bsk->bqk', attn.astype(dt), vh.astype(dt),
                                preferred_element_type=f32))  # (B, S, d_k)

    # Head-contiguous concat; wo was permuted in the wrapper so this matches
    # torch's interleaved stack(heads, dim=3).view(B, S, -1).
    concat = jnp.concatenate(heads, axis=-1).reshape(B * S, H * d_k)

    # Single 32-deep output projection + bias, stored as a 2-D slab.
    out = jnp.dot(concat.astype(dt), wo_ref[...].astype(dt),
                  preferred_element_type=f32) + bo_ref[...]
    out_ref[...] = out.astype(out_ref.dtype)


def multihead_attention(K, Q, V, params, *, operand_dtype=jnp.float32):
    """Wrapper: fuses per-head weights, permutes Wo, calls the Pallas kernel."""
    wq, wk, wv = params['wq'], params['wk'], params['wv']
    bq, bk, bv = params['bq'], params['bk'], params['bv']
    Wo, bo = params['Wo'], params['bo']

    B, S, D = K.shape
    H, _, d_k = wq.shape
    scale = 1.0 / math.sqrt(d_k)

    # Fused projection weights: column h*d_k + i holds (head h, unit i).
    # Fold the 1/sqrt(d_k) score scaling into the query weights/bias.
    Wq_all = (wq * scale).transpose(1, 0, 2).reshape(D, H * d_k)
    Wk_all = wk.transpose(1, 0, 2).reshape(D, H * d_k)
    Wv_all = wv.transpose(1, 0, 2).reshape(D, H * d_k)
    bq_all = (bq * scale).reshape(1, H * d_k)
    bk_all = bk.reshape(1, H * d_k)
    bv_all = bv.reshape(1, H * d_k)

    # torch: concat = stack(heads, dim=3).view(B, S, -1) => interleaved column
    # j = i*H + h. Permute Wo^T rows so the kernel's head-contiguous concat
    # (column h*d_k + i) is mathematically identical.
    Wo_perm = Wo.T.reshape(d_k, H, D).transpose(1, 0, 2).reshape(H * d_k, D)
    bo2d = bo.reshape(1, D)

    # Collapse (B, S) -> B*S rows so the MXU sees single 2-D operands.
    Q2 = Q.reshape(B * S, D)
    K2 = K.reshape(B * S, D)
    V2 = V.reshape(B * S, D)

    kernel = functools.partial(mha_fused_kernel, B=B, S=S, H=H, d_k=d_k,
                               operand_dtype=operand_dtype)

    n_inputs = 11
    out2d = pl.pallas_call(
        kernel,
        out_shape=jax.ShapeDtypeStruct((B * S, D), jnp.float32),
        in_specs=[pl.BlockSpec(memory_space=pltpu.MemorySpace.VMEM)
                  for _ in range(n_inputs)],
        out_specs=pl.BlockSpec(memory_space=pltpu.MemorySpace.VMEM),
    )(Q2, K2, V2, Wq_all, Wk_all, Wv_all, bq_all, bk_all, bv_all, Wo_perm, bo2d)

    return out2d.reshape(B, S, D)


def ref_forward(K, Q, V, params):
    """Pure-JAX reference reproducing the exact torch forward semantics."""
    wq, wk, wv = params['wq'], params['wk'], params['wv']
    bq, bk, bv = params['bq'], params['bk'], params['bv']
    Wo, bo = params['Wo'], params['bo']
    H, _, d_k = wq.shape
    B, S, _ = K.shape

    heads = []
    for h in range(H):
        key = K @ wk[h] + bk[h, 0]
        query = Q @ wq[h] + bq[h, 0]
        value = V @ wv[h] + bv[h, 0]
        scores = jnp.einsum('bqk,bsk->bqs', query, key) / math.sqrt(d_k)
        m = scores.max(axis=0, keepdims=True)            # softmax over dim 0
        e = jnp.exp(scores - m)
        attn = e / e.sum(axis=0, keepdims=True)
        heads.append(jnp.einsum('bqs,bsk->bqk', attn, value))
    concat = jnp.stack(heads, axis=3).reshape(B, S, -1)   # interleaved: j = i*H + h
    return concat @ Wo.T + bo


if __name__ == "__main__":
    B, S, D, H = 2, 8, 32, 4          # batch, seq (clone), d_attn, num_heads
    d_k = D // H

    key = jax.random.PRNGKey(0)
    kK, kQ, kV, k1, k2, k3, k4, k5, k6, k7, k8 = jax.random.split(key, 11)

    K = jax.random.normal(kK, (B, S, D), jnp.float32)
    Q = jax.random.normal(kQ, (B, S, D), jnp.float32)
    V = jax.random.normal(kV, (B, S, D), jnp.float32)

    lim = 1.0 / math.sqrt(D)          # nn.Linear-style uniform init bound
    params = dict(
        wq=jax.random.uniform(k1, (H, D, d_k), jnp.float32, -lim, lim),
        wk=jax.random.uniform(k2, (H, D, d_k), jnp.float32, -lim, lim),
        wv=jax.random.uniform(k3, (H, D, d_k), jnp.float32, -lim, lim),
        bq=jax.random.uniform(k4, (H, 1, d_k), jnp.float32, -lim, lim),
        bk=jax.random.uniform(k5, (H, 1, d_k), jnp.float32, -lim, lim),
        bv=jax.random.uniform(k6, (H, 1, d_k), jnp.float32, -lim, lim),
        Wo=jax.random.uniform(k7, (D, D), jnp.float32, -lim, lim),
        bo=jax.random.uniform(k8, (D,), jnp.float32, -lim, lim),
    )

    ref = ref_forward(K, Q, V, params)

    # f32 path: tight check against the exact torch semantics.
    out = multihead_attention(K, Q, V, params)
    out = jax.block_until_ready(out)
    assert out.shape == (B, S, D)
    assert jnp.allclose(out, ref, rtol=1e-5, atol=1e-5), \
        f"f32 max abs err = {float(jnp.max(jnp.abs(out - ref)))}"

    # bf16-operand path (MXU-friendly on v6e/v7x; accumulation/softmax stay f32).
    # bf16 operand rounding dominates the error, so the tolerance is loosened.
    out_bf16 = multihead_attention(K, Q, V, params, operand_dtype=jnp.bfloat16)
    out_bf16 = jax.block_until_ready(out_bf16)
    assert out_bf16.shape == (B, S, D)
    assert jnp.allclose(out_bf16, ref, rtol=1e-1, atol=1e-1), \
        f"bf16 max abs err = {float(jnp.max(jnp.abs(out_bf16 - ref)))}"

    print("KERNEL_OK")
</pallas_src>

<mosaic_0001>
module attributes {stable_mosaic.version = 11 : i64} {
  func.func @mha_fused_kernel(%arg0: memref<16x32xf32, #tpu.memory_space<vmem>>, %arg1: memref<16x32xf32, #tpu.memory_space<vmem>>, %arg2: memref<16x32xf32, #tpu.memory_space<vmem>>, %arg3: memref<32x32xf32, #tpu.memory_space<vmem>>, %arg4: memref<32x32xf32, #tpu.memory_space<vmem>>, %arg5: memref<32x32xf32, #tpu.memory_space<vmem>>, %arg6: memref<1x32xf32, #tpu.memory_space<vmem>>, %arg7: memref<1x32xf32, #tpu.memory_space<vmem>>, %arg8: memref<1x32xf32, #tpu.memory_space<vmem>>, %arg9: memref<32x32xf32, #tpu.memory_space<vmem>>, %arg10: memref<1x32xf32, #tpu.memory_space<vmem>>, %arg11: memref<16x32xf32, #tpu.memory_space<vmem>>) attributes {dimension_semantics = [], scalar_prefetch = 0 : i64, scratch_operands = 0 : i64, tpu.core_type = #tpu.core_type<tc>} {
    %c0 = arith.constant 0 : index
    %c0_0 = arith.constant 0 : index
    %0 = vector.load %arg0[%c0, %c0_0] : memref<16x32xf32, #tpu.memory_space<vmem>>, vector<16x32xf32>
    %c0_1 = arith.constant 0 : index
    %c0_2 = arith.constant 0 : index
    %1 = vector.load %arg1[%c0_1, %c0_2] : memref<16x32xf32, #tpu.memory_space<vmem>>, vector<16x32xf32>
    %c0_3 = arith.constant 0 : index
    %c0_4 = arith.constant 0 : index
    %2 = vector.load %arg2[%c0_3, %c0_4] : memref<16x32xf32, #tpu.memory_space<vmem>>, vector<16x32xf32>
    %c0_5 = arith.constant 0 : index
    %c0_6 = arith.constant 0 : index
    %3 = vector.load %arg3[%c0_5, %c0_6] : memref<32x32xf32, #tpu.memory_space<vmem>>, vector<32x32xf32>
    %cst = arith.constant dense<0.000000e+00> : vector<16x32xf32>
    %4 = tpu.matmul %0, %3, %cst {dimension_numbers = #tpu.dot_dimension_numbers<[1], [0], [0], [1], [0, 0, 1, 1], [], []>} : vector<16x32xf32>, vector<32x32xf32>, vector<16x32xf32> -> vector<16x32xf32>
    %c0_7 = arith.constant 0 : index
    %c0_8 = arith.constant 0 : index
    %5 = vector.load %arg6[%c0_7, %c0_8] : memref<1x32xf32, #tpu.memory_space<vmem>>, vector<1x32xf32>
    %6 = vector.broadcast %5 : vector<1x32xf32> to vector<16x32xf32>
    %7 = arith.addf %4, %6 : vector<16x32xf32>
    %c0_9 = arith.constant 0 : index
    %c0_10 = arith.constant 0 : index
    %8 = vector.load %arg4[%c0_9, %c0_10] : memref<32x32xf32, #tpu.memory_space<vmem>>, vector<32x32xf32>
    %cst_11 = arith.constant dense<0.000000e+00> : vector<16x32xf32>
    %9 = tpu.matmul %1, %8, %cst_11 {dimension_numbers = #tpu.dot_dimension_numbers<[1], [0], [0], [1], [0, 0, 1, 1], [], []>} : vector<16x32xf32>, vector<32x32xf32>, vector<16x32xf32> -> vector<16x32xf32>
    %c0_12 = arith.constant 0 : index
    %c0_13 = arith.constant 0 : index
    %10 = vector.load %arg7[%c0_12, %c0_13] : memref<1x32xf32, #tpu.memory_space<vmem>>, vector<1x32xf32>
    %11 = vector.broadcast %10 : vector<1x32xf32> to vector<16x32xf32>
    %12 = arith.addf %9, %11 : vector<16x32xf32>
    %c0_14 = arith.constant 0 : index
    %c0_15 = arith.constant 0 : index
    %13 = vector.load %arg5[%c0_14, %c0_15] : memref<32x32xf32, #tpu.memory_space<vmem>>, vector<32x32xf32>
    %cst_16 = arith.constant dense<0.000000e+00> : vector<16x32xf32>
    %14 = tpu.matmul %2, %13, %cst_16 {dimension_numbers = #tpu.dot_dimension_numbers<[1], [0], [0], [1], [0, 0, 1, 1], [], []>} : vector<16x32xf32>, vector<32x32xf32>, vector<16x32xf32> -> vector<16x32xf32>
    %c0_17 = arith.constant 0 : index
    %c0_18 = arith.constant 0 : index
    %15 = vector.load %arg8[%c0_17, %c0_18] : memref<1x32xf32, #tpu.memory_space<vmem>>, vector<1x32xf32>
    %16 = vector.broadcast %15 : vector<1x32xf32> to vector<16x32xf32>
    %17 = arith.addf %14, %16 : vector<16x32xf32>
    %18 = vector.shape_cast %7 : vector<16x32xf32> to vector<2x8x32xf32>
    %19 = vector.shape_cast %12 : vector<16x32xf32> to vector<2x8x32xf32>
    %20 = vector.shape_cast %17 : vector<16x32xf32> to vector<2x8x32xf32>
    %21 = vector.extract_strided_slice %18 {offsets = [0, 0, 0], sizes = [2, 8, 8], strides = [1, 1, 1]} : vector<2x8x32xf32> to vector<2x8x8xf32>
    %22 = vector.extract_strided_slice %19 {offsets = [0, 0, 0], sizes = [2, 8, 8], strides = [1, 1, 1]} : vector<2x8x32xf32> to vector<2x8x8xf32>
    %23 = vector.extract_strided_slice %20 {offsets = [0, 0, 0], sizes = [2, 8, 8], strides = [1, 1, 1]} : vector<2x8x32xf32> to vector<2x8x8xf32>
    "tpu.trace_start"() <{level = 10 : i32, message = "bqk,bsk->bqs"}> : () -> ()
    %cst_19 = arith.constant dense<0.000000e+00> : vector<2x8x8xf32>
    %24 = tpu.matmul %21, %22, %cst_19 {dimension_numbers = #tpu.dot_dimension_numbers<[2], [2], [1], [1], [0, 0, 0, 1, 1, 1], [0], [0]>} : vector<2x8x8xf32>, vector<2x8x8xf32>, vector<2x8x8xf32> -> vector<2x8x8xf32>
    "tpu.trace_stop"() : () -> ()
    %cst_20 = arith.constant dense<0xFF800000> : vector<8x8xf32>
    %25 = vector.multi_reduction <maximumf>, %24, %cst_20 [0] : vector<2x8x8xf32> to vector<8x8xf32>
    %26 = vector.shape_cast %25 : vector<8x8xf32> to vector<1x8x8xf32>
    %27 = vector.broadcast %26 : vector<1x8x8xf32> to vector<2x8x8xf32>
    %28 = arith.subf %24, %27 : vector<2x8x8xf32>
    %29 = math.exp %28 : vector<2x8x8xf32>
    %cst_21 = arith.constant dense<0.000000e+00> : vector<8x8xf32>
    %30 = vector.multi_reduction <add>, %29, %cst_21 [0] : vector<2x8x8xf32> to vector<8x8xf32>
    %31 = vector.shape_cast %30 : vector<8x8xf32> to vector<1x8x8xf32>
    %32 = tpu.reciprocal %31 : vector<1x8x8xf32> -> vector<1x8x8xf32>
    %33 = vector.broadcast %32 : vector<1x8x8xf32> to vector<2x8x8xf32>
    %34 = arith.mulf %29, %33 : vector<2x8x8xf32>
    "tpu.trace_start"() <{level = 10 : i32, message = "bqs,bsk->bqk"}> : () -> ()
    %cst_22 = arith.constant dense<0.000000e+00> : vector<2x8x8xf32>
    %35 = tpu.matmul %34, %23, %cst_22 {dimension_numbers = #tpu.dot_dimension_numbers<[2], [1], [1], [2], [0, 0, 0, 1, 1, 2], [0], [0]>} : vector<2x8x8xf32>, vector<2x8x8xf32>, vector<2x8x8xf32> -> vector<2x8x8xf32>
    "tpu.trace_stop"() : () -> ()
    %36 = vector.extract_strided_slice %18 {offsets = [0, 0, 8], sizes = [2, 8, 8], strides = [1, 1, 1]} : vector<2x8x32xf32> to vector<2x8x8xf32>
    %37 = vector.extract_strided_slice %19 {offsets = [0, 0, 8], sizes = [2, 8, 8], strides = [1, 1, 1]} : vector<2x8x32xf32> to vector<2x8x8xf32>
    %38 = vector.extract_strided_slice %20 {offsets = [0, 0, 8], sizes = [2, 8, 8], strides = [1, 1, 1]} : vector<2x8x32xf32> to vector<2x8x8xf32>
    "tpu.trace_start"() <{level = 10 : i32, message = "bqk,bsk->bqs"}> : () -> ()
    %cst_23 = arith.constant dense<0.000000e+00> : vector<2x8x8xf32>
    %39 = tpu.matmul %36, %37, %cst_23 {dimension_numbers = #tpu.dot_dimension_numbers<[2], [2], [1], [1], [0, 0, 0, 1, 1, 1], [0], [0]>} : vector<2x8x8xf32>, vector<2x8x8xf32>, vector<2x8x8xf32> -> vector<2x8x8xf32>
    "tpu.trace_stop"() : () -> ()
    %cst_24 = arith.constant dense<0xFF800000> : vector<8x8xf32>
    %40 = vector.multi_reduction <maximumf>, %39, %cst_24 [0] : vector<2x8x8xf32> to vector<8x8xf32>
    %41 = vector.shape_cast %40 : vector<8x8xf32> to vector<1x8x8xf32>
    %42 = vector.broadcast %41 : vector<1x8x8xf32> to vector<2x8x8xf32>
    %43 = arith.subf %39, %42 : vector<2x8x8xf32>
    %44 = math.exp %43 : vector<2x8x8xf32>
    %cst_25 = arith.constant dense<0.000000e+00> : vector<8x8xf32>
    %45 = vector.multi_reduction <add>, %44, %cst_25 [0] : vector<2x8x8xf32> to vector<8x8xf32>
    %46 = vector.shape_cast %45 : vector<8x8xf32> to vector<1x8x8xf32>
    %47 = tpu.reciprocal %46 : vector<1x8x8xf32> -> vector<1x8x8xf32>
    %48 = vector.broadcast %47 : vector<1x8x8xf32> to vector<2x8x8xf32>
    %49 = arith.mulf %44, %48 : vector<2x8x8xf32>
    "tpu.trace_start"() <{level = 10 : i32, message = "bqs,bsk->bqk"}> : () -> ()
    %cst_26 = arith.constant dense<0.000000e+00> : vector<2x8x8xf32>
    %50 = tpu.matmul %49, %38, %cst_26 {dimension_numbers = #tpu.dot_dimension_numbers<[2], [1], [1], [2], [0, 0, 0, 1, 1, 2], [0], [0]>} : vector<2x8x8xf32>, vector<2x8x8xf32>, vector<2x8x8xf32> -> vector<2x8x8xf32>
    "tpu.trace_stop"() : () -> ()
    %51 = vector.extract_strided_slice %18 {offsets = [0, 0, 16], sizes = [2, 8, 8], strides = [1, 1, 1]} : vector<2x8x32xf32> to vector<2x8x8xf32>
    %52 = vector.extract_strided_slice %19 {offsets = [0, 0, 16], sizes = [2, 8, 8], strides = [1, 1, 1]} : vector<2x8x32xf32> to vector<2x8x8xf32>
    %53 = vector.extract_strided_slice %20 {offsets = [0, 0, 16], sizes = [2, 8, 8], strides = [1, 1, 1]} : vector<2x8x32xf32> to vector<2x8x8xf32>
    "tpu.trace_start"() <{level = 10 : i32, message = "bqk,bsk->bqs"}> : () -> ()
    %cst_27 = arith.constant dense<0.000000e+00> : vector<2x8x8xf32>
    %54 = tpu.matmul %51, %52, %cst_27 {dimension_numbers = #tpu.dot_dimension_numbers<[2], [2], [1], [1], [0, 0, 0, 1, 1, 1], [0], [0]>} : vector<2x8x8xf32>, vector<2x8x8xf32>, vector<2x8x8xf32> -> vector<2x8x8xf32>
    "tpu.trace_stop"() : () -> ()
    %cst_28 = arith.constant dense<0xFF800000> : vector<8x8xf32>
    %55 = vector.multi_reduction <maximumf>, %54, %cst_28 [0] : vector<2x8x8xf32> to vector<8x8xf32>
    %56 = vector.shape_cast %55 : vector<8x8xf32> to vector<1x8x8xf32>
    %57 = vector.broadcast %56 : vector<1x8x8xf32> to vector<2x8x8xf32>
    %58 = arith.subf %54, %57 : vector<2x8x8xf32>
    %59 = math.exp %58 : vector<2x8x8xf32>
    %cst_29 = arith.constant dense<0.000000e+00> : vector<8x8xf32>
    %60 = vector.multi_reduction <add>, %59, %cst_29 [0] : vector<2x8x8xf32> to vector<8x8xf32>
    %61 = vector.shape_cast %60 : vector<8x8xf32> to vector<1x8x8xf32>
    %62 = tpu.reciprocal %61 : vector<1x8x8xf32> -> vector<1x8x8xf32>
    %63 = vector.broadcast %62 : vector<1x8x8xf32> to vector<2x8x8xf32>
    %64 = arith.mulf %59, %63 : vector<2x8x8xf32>
    "tpu.trace_start"() <{level = 10 : i32, message = "bqs,bsk->bqk"}> : () -> ()
    %cst_30 = arith.constant dense<0.000000e+00> : vector<2x8x8xf32>
    %65 = tpu.matmul %64, %53, %cst_30 {dimension_numbers = #tpu.dot_dimension_numbers<[2], [1], [1], [2], [0, 0, 0, 1, 1, 2], [0], [0]>} : vector<2x8x8xf32>, vector<2x8x8xf32>, vector<2x8x8xf32> -> vector<2x8x8xf32>
    "tpu.trace_stop"() : () -> ()
    %66 = vector.extract_strided_slice %18 {offsets = [0, 0, 24], sizes = [2, 8, 8], strides = [1, 1, 1]} : vector<2x8x32xf32> to vector<2x8x8xf32>
    %67 = vector.extract_strided_slice %19 {offsets = [0, 0, 24], sizes = [2, 8, 8], strides = [1, 1, 1]} : vector<2x8x32xf32> to vector<2x8x8xf32>
    %68 = vector.extract_strided_slice %20 {offsets = [0, 0, 24], sizes = [2, 8, 8], strides = [1, 1, 1]} : vector<2x8x32xf32> to vector<2x8x8xf32>
    "tpu.trace_start"() <{level = 10 : i32, message = "bqk,bsk->bqs"}> : () -> ()
    %cst_31 = arith.constant dense<0.000000e+00> : vector<2x8x8xf32>
    %69 = tpu.matmul %66, %67, %cst_31 {dimension_numbers = #tpu.dot_dimension_numbers<[2], [2], [1], [1], [0, 0, 0, 1, 1, 1], [0], [0]>} : vector<2x8x8xf32>, vector<2x8x8xf32>, vector<2x8x8xf32> -> vector<2x8x8xf32>
    "tpu.trace_stop"() : () -> ()
    %cst_32 = arith.constant dense<0xFF800000> : vector<8x8xf32>
    %70 = vector.multi_reduction <maximumf>, %69, %cst_32 [0] : vector<2x8x8xf32> to vector<8x8xf32>
    %71 = vector.shape_cast %70 : vector<8x8xf32> to vector<1x8x8xf32>
    %72 = vector.broadcast %71 : vector<1x8x8xf32> to vector<2x8x8xf32>
    %73 = arith.subf %69, %72 : vector<2x8x8xf32>
    %74 = math.exp %73 : vector<2x8x8xf32>
    %cst_33 = arith.constant dense<0.000000e+00> : vector<8x8xf32>
    %75 = vector.multi_reduction <add>, %74, %cst_33 [0] : vector<2x8x8xf32> to vector<8x8xf32>
    %76 = vector.shape_cast %75 : vector<8x8xf32> to vector<1x8x8xf32>
    %77 = tpu.reciprocal %76 : vector<1x8x8xf32> -> vector<1x8x8xf32>
    %78 = vector.broadcast %77 : vector<1x8x8xf32> to vector<2x8x8xf32>
    %79 = arith.mulf %74, %78 : vector<2x8x8xf32>
    "tpu.trace_start"() <{level = 10 : i32, message = "bqs,bsk->bqk"}> : () -> ()
    %cst_34 = arith.constant dense<0.000000e+00> : vector<2x8x8xf32>
    %80 = tpu.matmul %79, %68, %cst_34 {dimension_numbers = #tpu.dot_dimension_numbers<[2], [1], [1], [2], [0, 0, 0, 1, 1, 2], [0], [0]>} : vector<2x8x8xf32>, vector<2x8x8xf32>, vector<2x8x8xf32> -> vector<2x8x8xf32>
    "tpu.trace_stop"() : () -> ()
    %81 = tpu.concatenate %35, %50, %65, %80 in 2 : vector<2x8x8xf32>, vector<2x8x8xf32>, vector<2x8x8xf32>, vector<2x8x8xf32> -> vector<2x8x32xf32>
    %82 = vector.shape_cast %81 : vector<2x8x32xf32> to vector<16x32xf32>
    %c0_35 = arith.constant 0 : index
    %c0_36 = arith.constant 0 : index
    %83 = vector.load %arg9[%c0_35, %c0_36] : memref<32x32xf32, #tpu.memory_space<vmem>>, vector<32x32xf32>
    %cst_37 = arith.constant dense<0.000000e+00> : vector<16x32xf32>
    %84 = tpu.matmul %82, %83, %cst_37 {dimension_numbers = #tpu.dot_dimension_numbers<[1], [0], [0], [1], [0, 0, 1, 1], [], []>} : vector<16x32xf32>, vector<32x32xf32>, vector<16x32xf32> -> vector<16x32xf32>
    %c0_38 = arith.constant 0 : index
    %c0_39 = arith.constant 0 : index
    %85 = vector.load %arg10[%c0_38, %c0_39] : memref<1x32xf32, #tpu.memory_space<vmem>>, vector<1x32xf32>
    %86 = vector.broadcast %85 : vector<1x32xf32> to vector<16x32xf32>
    %87 = arith.addf %84, %86 : vector<16x32xf32>
    %c0_40 = arith.constant 0 : index
    %c0_41 = arith.constant 0 : index
    %88 = vector.load %arg11[%c0_40, %c0_41] : memref<16x32xf32, #tpu.memory_space<vmem>>, vector<16x32xf32>
    tpu.vector_store %arg11[%c0_40, %c0_41], %87 {strides = array<i32>} : memref<16x32xf32, #tpu.memory_space<vmem>>, vector<16x32xf32>,
    return
  }
}

</mosaic_0001>

<bundles_post_ra>
// kernel: tpu_custom_call.1
= control target key start
LH: loop header
LB: loop body
LE: loop exit
PB: predicated region body
PF: predicated region fallthrough
CT: control target
= control target key end

     0   :  { %16 = vsyncpa [#allocation3], 0  ;;  %s1384_s0 = inlined_call_operand.hbm [shape: f32[16,32], index: 0, kind: input, shape index: {}]   ;;  %s1385_s1 = inlined_call_operand.hbm [shape: f32[16,32], index: 1, kind: input, shape index: {}]   ;;  %s1386_s2 = inlined_call_operand.hbm [shape: f32[16,32], index: 2, kind: input, shape index: {}]   ;;  %s1387_s3 = inlined_call_operand.hbm [shape: f32[32,32], index: 3, kind: input, shape index: {}]   ;;  %s1388_s4 = inlined_call_operand.hbm [shape: f32[32,32], index: 4, kind: input, shape index: {}]   ;;  %s1389_s5 = inlined_call_operand.hbm [shape: f32[32,32], index: 5, kind: input, shape index: {}]   ;;  %s1390_s6 = inlined_call_operand.vmem [shape: f32[1,32], index: 6, kind: input, shape index: {}]   ;;  %s1391_s7 = inlined_call_operand.vmem [shape: f32[1,32], index: 7, kind: input, shape index: {}]   ;;  %s1392_s8 = inlined_call_operand.vmem [shape: f32[1,32], index: 8, kind: input, shape index: {}]   ;;  %s1393_s9 = inlined_call_operand.hbm [shape: f32[32,32], index: 9, kind: input, shape index: {}]   ;;  %s1394_s10 = inlined_call_operand.vmem [shape: f32[1,32], index: 10, kind: input, shape index: {}]   ;;  %s1395_s11 = inlined_call_operand.hbm [shape: f32[16,32], index: 11, kind: output, shape index: {}]  }
   0x1   :  { %17 = vsyncpa [#allocation6], 0 }
   0x2   :  { %18 = vsyncpa [#allocation9], 0 }
   0x3   :  { %19 = vsyncpa [#allocation12], 0 }
   0x4   :  { %20 = vsyncpa [#allocation4], 0  ;;  %s38_s19 = sshll.u32 %s1385_s1, 4  ;;  %s1177_s20 = smov [#allocation5]   ;;  %s39_s19 = int_to_ptr.hbm [resolvable:$true] %s38_s19 }
   0x5   :  { %s40_s21 = sshll.u32 %s1177_s20, 4  ;;  %s64_s24 = sshll.u32 %s1387_s3, 4  ;;  %s41_s21 = int_to_ptr.vmem [resolvable:$true] %s40_s21  ;;  %s65_s24 = int_to_ptr.hbm [resolvable:$true] %s64_s24 }
   0x6   :  { %s1178_s25 = smov 128   ;;  %s1179_s26 = smov 8  }
   0x7   :  { %46 = dma.hbm_to_vmem [thread:$0]  %s39_s19, 256, %s41_s21, [#allocation6], %s1178_s25, %s1178_s25, %s1179_s26  }
   0x8   :  { %s1180_s27 = smov [#allocation8]   ;;  %s90_s1 = sshll.u32 %s1389_s5, 4  ;;  %s91_s1 = int_to_ptr.hbm [resolvable:$true] %s90_s1 }
   0x9   :  { %s66_s28 = sshll.u32 %s1180_s27, 4  ;;  %s25_s13 = sshll.u32 %s1384_s0, 4  ;;  %s67_s28 = int_to_ptr.vmem [resolvable:$true] %s66_s28  ;;  %s26_s13 = int_to_ptr.hbm [resolvable:$true] %s25_s13 }
   0xa   :  { %72 = dma.hbm_to_vmem [thread:$0]  %s65_s24, 512, %s67_s28, [#allocation9], %s1178_s25, %s1178_s25, %s1179_s26  }
   0xb   :  { %s1181_s14 = smov [#allocation11]   ;;  %s1182_s16 = smov [#allocation2]  }
   0xc   :  { %s92_s15 = sshll.u32 %s1181_s14, 4  ;;  %s27_s5 = sshll.u32 %s1182_s16, 4  ;;  %s93_s15 = int_to_ptr.vmem [resolvable:$true] %s92_s15  ;;  %s28_s5 = int_to_ptr.vmem [resolvable:$true] %s27_s5 }
   0xd   :  { %98 = dma.hbm_to_vmem [thread:$0]  %s91_s1, 512, %s93_s15, [#allocation12], %s1178_s25, %s1178_s25, %s1179_s26  }
   0xe   :  { %s51_s19 = sshll.u32 %s1386_s2, 4  ;;  %s77_s21 = sshll.u32 %s1388_s4, 4  ;;  %s52_s19 = int_to_ptr.hbm [resolvable:$true] %s51_s19  ;;  %s78_s21 = int_to_ptr.hbm [resolvable:$true] %s77_s21 }
   0xf   :  { %33 = dma.hbm_to_vmem [thread:$0]  %s26_s13, 256, %s28_s5, [#allocation3], %s1178_s25, %s1178_s25, %s1179_s26  }
  0x10   :  { %s1183_s22 = smov [#allocation7]   ;;  %s1184_s24 = smov [#allocation10]  }
  0x11   :  { %s53_s23 = sshll.u32 %s1183_s22, 4  ;;  %s79_s2 = sshll.u32 %s1184_s24, 4  ;;  %s54_s23 = int_to_ptr.vmem [resolvable:$true] %s53_s23  ;;  %s80_s2 = int_to_ptr.vmem [resolvable:$true] %s79_s2 }
  0x12   :  { %59 = dma.hbm_to_vmem [thread:$0]  %s52_s19, 256, %s54_s23, [#allocation6], %s1178_s25, %s1178_s25, %s1179_s26  }
  0x13   :  { %s109_s29 = sshll.u32 %s1393_s9, 4  ;;  %s1185_s4 = smov [#allocation13]   ;;  %s110_s29 = int_to_ptr.hbm [resolvable:$true] %s109_s29 }
  0x14   :  { %85 = dma.hbm_to_vmem [thread:$0]  %s78_s21, 512, %s80_s2, [#allocation9], %s1178_s25, %s1178_s25, %s1179_s26  }
  0x15   :  { %s111_s30 = sshll.u32 %s1185_s4, 4  ;;  %s112_s30 = int_to_ptr.vmem [resolvable:$true] %s111_s30 }
  0x16   :  { %117 = dma.hbm_to_vmem [thread:$0]  %s110_s29, 512, %s112_s30, [#allocation12], %s1178_s25, %s1178_s25, %s1179_s26  }
  0x17   :  { %1167 = dma.done.wait [#allocation3], 256  }
  0x18   :  { %1168 = vsyncadd [#allocation3], 4294967040 }
  0x19   :  { %1169 = dma.done.wait [#allocation6], 512  }
  0x1a   :  { %1170 = vsyncadd [#allocation6], 4294966784 }
  0x1b   :  { %1171 = dma.done.wait [#allocation9], 1024  }
  0x1c   :  { %1172 = vsyncadd [#allocation9], 4294966272 }
  0x1d   :  { %1173 = dma.done.wait [#allocation12], 1024  }
  0x1e   :  { %1174 = vsyncadd [#allocation12], 4294966272  ;;  %v157_v0 = vld [vmem:[#allocation8 + $0x18] sm:$0xff]  ;;  %v156_v2 = vld [vmem:[#allocation8 + $0x10] sm:$0xff]  ;;  %vm162_vm0 = vcmask 261120   ;;  %vm266_vm1 = vcmask 64512  }
  0x1f   :  { %v195_v1 = vld [vmem:[#allocation10 + $0x18] sm:$0xff]  ;;  %181 = vmatpush.msra.mxu0 %v157_v0  ;;  %v194_v3 = vld [vmem:[#allocation10 + $0x10] sm:$0xff]  ;;  %v155_v4 = vld [vmem:[#allocation8 + $0x8] sm:$0xff]  ;;  %s1186_s13 = smov 120   ;;  %s1190_s16 = smov 24  }
  0x20   :  { %218 = vmatpush.msra.mxu1 %v195_v1  ;;  %928 = vmatpush.msra.mxu2 %v195_v1  ;;  %v193_v5 = vld [vmem:[#allocation10 + $0x8] sm:$0xff]  ;;  %v154_v6 = vld [vmem:[#allocation8] sm:$0xff]  ;;  %v148_v8 = vld [vmem:[#allocation2] sm:$0xff]  ;;  %s1191_s18 = smov [#allocation14]   ;;  %s880_s21 = sshll.u32 %s1395_s11, 4  ;;  %s881_s21 = int_to_ptr.hbm [resolvable:$true] %s880_s21 }
  0x21   :  { %182 = vmatpush.msra.mxu0 %v156_v2  ;;  %v192_v7 = vld [vmem:[#allocation10] sm:$0xff]  ;;  %v151_v10 = vld [vmem:[#allocation5 + $0x8] sm:$0xff]  ;;  %v149_v11 = vld [vmem:[#allocation2 + $0x8] sm:$0xff]  ;;  %s878_s19 = sshll.u32 %s1191_s18, 4  ;;  %s879_s19 = int_to_ptr.vmem [resolvable:$true] %s878_s19 }
  0x22   :  { %219 = vmatpush.msra.mxu1 %v194_v3  ;;  %929 = vmatpush.msra.mxu2 %v194_v3  ;;  %v150_v9 = vld [vmem:[#allocation5] sm:$0xff]  ;;  %v232_v12 = vld [vmem:[#allocation11 + $0x18] sm:$0xff]  ;;  %v947_v13 = vld [vmem:[%s1390_s6] ss:$0 sm:$0xff]  ;;  %s1187_s6 = smov 112  }
  0x23   :  { %183 = vmatpush.msra.mxu0 %v155_v4  ;;  %v948_v14 = vld [vmem:[%s1391_s7] ss:$0 sm:$0xff]  ;;  %v230_v20 = vld [vmem:[#allocation11 + $0x8] sm:$0xff]  ;;  %v229_v21 = vld [vmem:[#allocation11] sm:$0xff]  ;;  %s1188_s7 = smov 104  }
  0x24   :  { %220 = vmatpush.msra.mxu1 %v193_v5  ;;  %930 = vmatpush.msra.mxu2 %v193_v5  ;;  %v231_v19 = vld [vmem:[#allocation11 + $0x10] sm:$0xff]  ;;  %v153_v27 = vld [vmem:[#allocation7 + $0x8] sm:$0xff] }
  0x25   :  { %184 = vmatpush.msra.mxu0 %v154_v6  ;;  %v152_v22 = vld [vmem:[#allocation7] sm:$0xff] }
  0x26   :  { %221 = vmatpush.msra.mxu1 %v192_v7  ;;  %931 = vmatpush.msra.mxu2 %v192_v7  ;;  %v949_v37 = vld [vmem:[%s1392_s8] ss:$0 sm:$0xff]  ;;  %s1189_s8 = smov 16  }
  0x27   :  { %896 = vmatmul.msk.f32.vlgmr.msra.gmra.mxu0 %vm162_vm0, %v148_v8  ;;  %898 = vmatmul.msk.f32.vlgmr.msra.gmra.mxu1 %vm162_vm0, %v150_v9 }
  0x28   :  { %899 = vmatmul.msk.f32.vlgmr.msra.gmra.mxu2 %vm162_vm0, %v151_v10 }
  0x29   :  { %255 = vmatpush.msrb.mxu2 %v232_v12 }
  0x2b   :  { %256 = vmatpush.msrb.mxu2 %v231_v19 }
  0x2d   :  { %257 = vmatpush.msrb.mxu2 %v230_v20 }
  0x2f   :  { %897 = vmatmul.msk.f32.gmra.mxu0 %vm162_vm0, %v149_v11  ;;  %258 = vmatpush.msrb.mxu2 %v229_v21 }
  0x30   :  { %900 = vmatmul.msk.f32.vlgmr.msrb.gmra.mxu2 %vm162_vm0, %v152_v22 }
  0x38   :  { %901 = vmatmul.msk.f32.gmra.mxu2 %vm162_vm0, %v153_v27 }
  0xa4   :  { %v186_v15 = vpop.f32.mrf.mxu0  ;;  %v223_v17 = vpop.f32.mrf.mxu1 }
  0xa5   :  { %v187_v16 = vadd.f32 %v947_v13, %v186_v15  ;;  %v224_v18 = vadd.f32 %v948_v14, %v223_v17 }
  0xa7   :  { %393 = vrot.lane.b32.xlu2 %v187_v16, %s1186_s13  ;;  %395 = vrot.lane.b32.xlu1 %v224_v18, %s1186_s13 }
  0xa8   :  { %902 = vmatpush.xpose.msk.msra.mxu3 %vm266_vm1, %v224_v18 }
  0xab   :  { %v226_v23 = vpop.f32.mrf.mxu2  ;;  %903 = vmatmul.msk.f32.vlgmr.msra.gmra.mxu3 %vm266_vm1, %v187_v16 }
  0xac   :  { %v227_v24 = vadd.f32 %v948_v14, %v226_v23  ;;  %v189_v25 = vpop.f32.mrf.mxu0 }
  0xad   :  { %v190_v26 = vadd.f32 %v947_v13, %v189_v25 }
  0xae   :  { %423 = vrot.lane.b32.xlu0 %v227_v24, %s1186_s13  ;;  %904 = vmatpush.xpose.msk.msrb.mxu3 %vm266_vm1, %v227_v24 }
  0xaf   :  { %559 = vrot.lane.b32.xlu2 %v190_v26, %s1187_s6  ;;  %561 = vrot.lane.b32.xlu1 %v227_v24, %s1187_s6 }
  0xb3   :  { %905 = vmatmul.msk.f32.vlgmr.msrb.gmra.mxu3 %vm266_vm1, %v190_v26  ;;  %v260_v38 = vpop.f32.mrf.mxu2 }
  0xb4   :  { %v261_v41 = vadd.f32 %v949_v37, %v260_v38 }
  0xb6   :  { %421 = vrot.lane.b32.xlu0 %v190_v26, %s1186_s13  ;;  %365 = vmatpush.msra.mxu3 %v261_v41 }
  0xb7   :  { %531 = vrot.lane.b32.xlu2 %v187_v16, %s1187_s6  ;;  %697 = vrot.lane.b32.xlu1 %v227_v24, %s1188_s7 }
  0xbb   :  { %v263_v47 = vpop.f32.mrf.mxu2 }
  0xbc   :  { %v264_v48 = vadd.f32 %v949_v37, %v263_v47 }
  0xbe   :  { %533 = vrot.lane.b32.xlu0 %v224_v18, %s1187_s6  ;;  %388 = vmatpush.msrb.mxu0 %v264_v48 }
  0xbf   :  { %667 = vrot.lane.b32.xlu2 %v187_v16, %s1188_s7  ;;  %669 = vrot.lane.b32.xlu1 %v224_v18, %s1188_s7 }
  0xc6   :  { %695 = vrot.lane.b32.xlu0 %v190_v26, %s1188_s7 }
  0xc7   :  { %615 = vrot.lane.b32.xlu1 %v261_v41, %s1187_s6  ;;  %505 = vrot.lane.b32.xlu2 %v264_v48, %s1186_s13 }
  0xce   :  { %478 = vrot.lane.b32.xlu0 %v261_v41, %s1186_s13 }
  0xcf   :  { %641 = vrot.lane.b32.xlu1 %v264_v48, %s1187_s6  ;;  %777 = vrot.lane.b32.xlu2 %v264_v48, %s1188_s7 }
  0xd6   :  { %751 = vrot.lane.b32.xlu0 %v261_v41, %s1188_s7 }
 0x101   :  { %v394_v29 = vpop.permute.xlu2 %393 }
 0x109   :  { %v560_v32 = vpop.permute.xlu2 %559 }
 0x111   :  { %v532_v39 = vpop.permute.xlu2 %531 }
 0x119   :  { %v396_v28 = vpop.permute.xlu1 %395  ;;  %v668_v51 = vpop.permute.xlu2 %667 }
 0x11a   :  { %908 = vmatpush.xpose.msk.msrb.mxu1 %vm266_vm1, %v396_v28 }
 0x11d   :  { %909 = vmatmul.msk.f32.vlgmr.msrb.gmra.mxu1 %vm266_vm1, %v394_v29 }
 0x120   :  { %v424_v30 = vpop.permute.xlu0 %423 }
 0x121   :  { %910 = vmatpush.xpose.msk.msra.mxu2 %vm266_vm1, %v424_v30  ;;  %v562_v31 = vpop.permute.xlu1 %561  ;;  %v506_v7 = vpop.permute.xlu2 %505 }
 0x122   :  { %526 = vmatpush.msra.mxu0 %v506_v7 }
 0x125   :  { %916 = vmatpush.xpose.msk.msrb.mxu2 %vm266_vm1, %v562_v31 }
 0x128   :  { %v422_v33 = vpop.permute.xlu0 %421 }
 0x129   :  { %911 = vmatmul.msk.f32.vlgmr.msra.gmra.mxu2 %vm266_vm1, %v422_v33  ;;  %v698_v34 = vpop.permute.xlu1 %697 }
 0x12a   :  { %922 = vmatpush.xpose.msk.msra.mxu2 %vm266_vm1, %v698_v34 }
 0x12e   :  { %v290_v35 = vpop.f32.mrf.mxu3 }
 0x12f   :  { %v319_v43 = vsel %vm266_vm1, %v290_v35, -inf }
 0x130   :  { %v534_v36 = vpop.permute.xlu0 %533 }
 0x131   :  { %914 = vmatpush.xpose.msk.msra.mxu1 %vm266_vm1, %v534_v36  ;;  %917 = vmatmul.msk.f32.vlgmr.msrb.gmra.mxu2 %vm266_vm1, %v560_v32  ;;  %v670_v40 = vpop.permute.xlu1 %669 }
 0x134   :  { %915 = vmatmul.msk.f32.vlgmr.msra.gmra.mxu1 %vm266_vm1, %v532_v39 }
 0x135   :  { %920 = vmatpush.xpose.msk.msrb.mxu1 %vm266_vm1, %v670_v40 }
 0x136   :  { %v316_v42 = vpop.f32.mrf.mxu3 }
 0x137   :  { %v320_v44 = vsel %vm266_vm1, %v316_v42, -inf }
 0x138   :  { %v321_v45 = vmax.f32 %v319_v43, %v320_v44  ;;  %v696_v46 = vpop.permute.xlu0 %695 }
 0x139   :  { %923 = vmatmul.msk.f32.vlgmr.msra.gmra.mxu2 %vm266_vm1, %v696_v46  ;;  %v616_v9 = vpop.permute.xlu1 %615 }
 0x13a   :  { %v322_v49 = vsub.f32 %v290_v35, %v321_v45  ;;  %v323_v50 = vsub.f32 %v316_v42, %v321_v45 }
 0x13c   :  { %v324_v52 = vmul.f32 1.442695, %v322_v49  ;;  %v326_v53 = vmul.f32 1.442695, %v323_v50  ;;  %921 = vmatmul.msk.f32.vlgmr.msrb.gmra.mxu1 %vm266_vm1, %v668_v51 }
 0x13e   :  { %951 = vpow2.f32 %v324_v52 }
 0x13f   :  { %953 = vpow2.f32 %v326_v53 }
 0x140   :  { %v479_v10 = vpop.permute.xlu0 %478 }
 0x141   :  { %499 = vmatpush.msrb.mxu3 %v479_v10  ;;  %v642_v18 = vpop.permute.xlu1 %641 }
 0x144   :  { %v952_v54 = vpop.eup %951 }
 0x145   :  { %v954_v55 = vpop.eup %953  ;;  %v328_v56 = vsel %vm266_vm1, %v952_v54, 0.0 }
 0x146   :  { %v329_v57 = vsel %vm266_vm1, %v954_v55, 0.0 }
 0x147   :  { %v330_v58 = vadd.f32 %v329_v57, %v328_v56 }
 0x149   :  { %955 = vrcp.f32 %v330_v58  ;;  %v342_v62 = vand.u32 2147483648, %v330_v58  ;;  %v340_v0 = vand.u32 2147483647, %v330_v58  ;;  %vm336_vm3 = vweird.f32 %v330_v58 }
 0x14b   :  { %v343_v2 = vor.u32 1.1754944e-38, %v342_v62  ;;  %vm341_vm5 = vcmp.eq.f32.partialorder %v340_v0, 8.507059e+37 }
 0x14f   :  { %v956_v59 = vpop.eup %955 }
 0x150   :  { %v332_v60 = vmul.f32 %v956_v59, %v330_v58  ;;  %vm337_vm2 = vweird.f32 %v956_v59 }
 0x151   :  { %vm338_vm4 = vmor %vm336_vm3, %vm337_vm2 }
 0x152   :  { %v333_v61 = vsub.f32 1.0, %v332_v60 }
 0x154   :  { %v334_v63 = vmul.f32 %v956_v59, %v333_v61 }
 0x156   :  { %v335_v1 = vadd.f32 %v956_v59, %v334_v63 }
 0x158   :  { %v339_v3 = vsel %vm338_vm4, %v956_v59, %v335_v1  ;;  %vm829_vm4 = vcmask 130048  }
 0x159   :  { %v344_v4 = vsel %vm341_vm5, %v343_v2, %v339_v3  ;;  %vm832_vm5 = vcmask 195584  }
 0x15a   :  { %v345_v5 = vmul.f32 %v952_v54, %v344_v4  ;;  %v346_v6 = vmul.f32 %v954_v55, %v344_v4  ;;  %v752_v4 = vpop.permute.xlu0 %751 }
 0x15c   :  { %906 = vmatmul.msk.f32.vlgmr.msra.gmra.mxu3 %vm266_vm1, %v345_v5  ;;  %907 = vmatmul.msk.f32.vlgmr.msrb.gmra.mxu0 %vm266_vm1, %v346_v6 }
 0x15d   :  { %636 = vmatpush.msra.mxu3 %v616_v9  ;;  %662 = vmatpush.msrb.mxu0 %v642_v18 }
 0x19a   :  { %v418_v8 = vpop.f32.mrf.mxu1 }
 0x19b   :  { %v449_v12 = vsel %vm266_vm1, %v418_v8, -inf }
 0x1ac   :  { %v446_v11 = vpop.f32.mrf.mxu2 }
 0x1ad   :  { %v450_v13 = vsel %vm266_vm1, %v446_v11, -inf }
 0x1ae   :  { %v451_v14 = vmax.f32 %v449_v12, %v450_v13 }
 0x1b0   :  { %v452_v15 = vsub.f32 %v418_v8, %v451_v14  ;;  %v453_v16 = vsub.f32 %v446_v11, %v451_v14  ;;  %v778_v8 = vpop.permute.xlu2 %777 }
 0x1b1   :  { %v556_v17 = vpop.f32.mrf.mxu1 }
 0x1b2   :  { %v454_v19 = vmul.f32 1.442695, %v452_v15  ;;  %v456_v20 = vmul.f32 1.442695, %v453_v16  ;;  %v587_v22 = vsel %vm266_vm1, %v556_v17, -inf }
 0x1b4   :  { %957 = vpow2.f32 %v454_v19  ;;  %v584_v21 = vpop.f32.mrf.mxu2 }
 0x1b5   :  { %959 = vpow2.f32 %v456_v20  ;;  %v588_v23 = vsel %vm266_vm1, %v584_v21, -inf }
 0x1b6   :  { %v589_v24 = vmax.f32 %v587_v22, %v588_v23 }
 0x1b8   :  { %v590_v25 = vsub.f32 %v556_v17, %v589_v24  ;;  %v591_v26 = vsub.f32 %v584_v21, %v589_v24 }
 0x1b9   :  { %v692_v30 = vpop.f32.mrf.mxu1 }
 0x1ba   :  { %v958_v27 = vpop.eup %957  ;;  %v592_v28 = vmul.f32 1.442695, %v590_v25  ;;  %v594_v29 = vmul.f32 1.442695, %v591_v26  ;;  %v723_v36 = vsel %vm266_vm1, %v692_v30, -inf }
 0x1bb   :  { %v960_v31 = vpop.eup %959  ;;  %v458_v32 = vsel %vm266_vm1, %v958_v27, 0.0 }
 0x1bc   :  { %v459_v33 = vsel %vm266_vm1, %v960_v31, 0.0  ;;  %961 = vpow2.f32 %v592_v28  ;;  %v720_v34 = vpop.f32.mrf.mxu2 }
 0x1bd   :  { %v460_v35 = vadd.f32 %v459_v33, %v458_v32  ;;  %963 = vpow2.f32 %v594_v29  ;;  %v724_v37 = vsel %vm266_vm1, %v720_v34, -inf }
 0x1be   :  { %v725_v38 = vmax.f32 %v723_v36, %v724_v37  ;;  %v837_v36 = vld [vmem:[#allocation13 + $0x10] sm:$0xff]  ;;  %v836_v37 = vld [vmem:[#allocation13 + $0x8] sm:$0xff] }
 0x1bf   :  { %965 = vrcp.f32 %v460_v35  ;;  %v472_v51 = vand.u32 2147483648, %v460_v35  ;;  %v470_v54 = vand.u32 2147483647, %v460_v35  ;;  %vm466_vm7 = vweird.f32 %v460_v35 }
 0x1c0   :  { %v726_v39 = vsub.f32 %v692_v30, %v725_v38  ;;  %v727_v40 = vsub.f32 %v720_v34, %v725_v38  ;;  %v835_v38 = vld [vmem:[#allocation13] sm:$0xff] }
 0x1c1   :  { %v473_v60 = vor.u32 1.1754944e-38, %v472_v51  ;;  %vm471_vm9 = vcmp.eq.f32.partialorder %v470_v54, 8.507059e+37  ;;  %v950_v51 = vld [vmem:[%s1394_s10] ss:$0 sm:$0xff] }
 0x1c2   :  { %v962_v41 = vpop.eup %961  ;;  %v728_v42 = vmul.f32 1.442695, %v726_v39  ;;  %v730_v43 = vmul.f32 1.442695, %v727_v40 }
 0x1c3   :  { %v964_v44 = vpop.eup %963  ;;  %v596_v45 = vsel %vm266_vm1, %v962_v41, 0.0 }
 0x1c4   :  { %v597_v46 = vsel %vm266_vm1, %v964_v44, 0.0  ;;  %967 = vpow2.f32 %v728_v42 }
 0x1c5   :  { %v966_v47 = vpop.eup %965  ;;  %v598_v48 = vadd.f32 %v597_v46, %v596_v45  ;;  %969 = vpow2.f32 %v730_v43 }
 0x1c6   :  { %v462_v49 = vmul.f32 %v966_v47, %v460_v35  ;;  %vm467_vm6 = vweird.f32 %v966_v47  ;;  %v838_v35 = vld [vmem:[#allocation13 + $0x18] sm:$0xff] }
 0x1c7   :  { %971 = vrcp.f32 %v598_v48  ;;  %vm468_vm8 = vmor %vm466_vm7, %vm467_vm6  ;;  %v610_v5 = vand.u32 2147483648, %v598_v48  ;;  %v608_v7 = vand.u32 2147483647, %v598_v48  ;;  %vm604_vm11 = vweird.f32 %v598_v48  ;;  %861 = vmatpush.msra.mxu1 %v838_v35 }
 0x1c8   :  { %v463_v50 = vsub.f32 1.0, %v462_v49 }
 0x1c9   :  { %v611_v11 = vor.u32 1.1754944e-38, %v610_v5  ;;  %vm609_vm13 = vcmp.eq.f32.partialorder %v608_v7, 8.507059e+37  ;;  %862 = vmatpush.msra.mxu1 %v837_v36 }
 0x1ca   :  { %v968_v52 = vpop.eup %967  ;;  %v464_v53 = vmul.f32 %v966_v47, %v463_v50 }
 0x1cb   :  { %v970_v55 = vpop.eup %969  ;;  %v732_v56 = vsel %vm266_vm1, %v968_v52, 0.0  ;;  %863 = vmatpush.msra.mxu1 %v836_v37 }
 0x1cc   :  { %v465_v57 = vadd.f32 %v966_v47, %v464_v53  ;;  %v733_v58 = vsel %vm266_vm1, %v970_v55, 0.0 }
 0x1cd   :  { %v972_v59 = vpop.eup %971  ;;  %v734_v61 = vadd.f32 %v733_v58, %v732_v56  ;;  %864 = vmatpush.msra.mxu1 %v835_v38 }
 0x1ce   :  { %v469_v62 = vsel %vm468_vm8, %v966_v47, %v465_v57  ;;  %v600_v63 = vmul.f32 %v972_v59, %v598_v48  ;;  %vm605_vm10 = vweird.f32 %v972_v59 }
 0x1cf   :  { %v474_v0 = vsel %vm471_vm9, %v473_v60, %v469_v62  ;;  %973 = vrcp.f32 %v734_v61  ;;  %vm606_vm12 = vmor %vm604_vm11, %vm605_vm10  ;;  %v746_v18 = vand.u32 2147483648, %v734_v61  ;;  %v744_v20 = vand.u32 2147483647, %v734_v61 }
 0x1d0   :  { %v475_v1 = vmul.f32 %v958_v27, %v474_v0  ;;  %v476_v2 = vmul.f32 %v960_v31, %v474_v0  ;;  %v601_v3 = vsub.f32 1.0, %v600_v63  ;;  %vm740_vm15 = vweird.f32 %v734_v61 }
 0x1d1   :  { %v747_v22 = vor.u32 1.1754944e-38, %v746_v18  ;;  %vm745_vm3 = vcmp.eq.f32.partialorder %v744_v20, 8.507059e+37 }
 0x1d2   :  { %v602_v6 = vmul.f32 %v972_v59, %v601_v3  ;;  %912 = vmatmul.msk.f32.vlgmr.msrb.gmra.mxu3 %vm266_vm1, %v475_v1  ;;  %913 = vmatmul.msk.f32.vlgmr.msra.gmra.mxu0 %vm266_vm1, %v476_v2 }
 0x1d3   :  { %772 = vmatpush.msrb.mxu3 %v752_v4  ;;  %798 = vmatpush.msra.mxu0 %v778_v8 }
 0x1d4   :  { %v603_v9 = vadd.f32 %v972_v59, %v602_v6 }
 0x1d5   :  { %v974_v10 = vpop.eup %973 }
 0x1d6   :  { %v607_v12 = vsel %vm606_vm12, %v972_v59, %v603_v9  ;;  %v736_v13 = vmul.f32 %v974_v10, %v734_v61  ;;  %vm741_vm14 = vweird.f32 %v974_v10 }
 0x1d7   :  { %v612_v14 = vsel %vm609_vm13, %v611_v11, %v607_v12  ;;  %vm742_vm2 = vmor %vm740_vm15, %vm741_vm14 }
 0x1d8   :  { %v613_v15 = vmul.f32 %v962_v41, %v612_v14  ;;  %v614_v16 = vmul.f32 %v964_v44, %v612_v14  ;;  %v737_v17 = vsub.f32 1.0, %v736_v13 }
 0x1d9   :  { %v390_v28 = vpop.f32.mrf.mxu0 }
 0x1da   :  { %v738_v19 = vmul.f32 %v974_v10, %v737_v17  ;;  %918 = vmatmul.msk.f32.vlgmr.msra.gmra.mxu3 %vm266_vm1, %v613_v15  ;;  %919 = vmatmul.msk.f32.vlgmr.msrb.gmra.mxu0 %vm266_vm1, %v614_v16 }
 0x1dc   :  { %v739_v21 = vadd.f32 %v974_v10, %v738_v19 }
 0x1de   :  { %v743_v23 = vsel %vm742_vm2, %v974_v10, %v739_v21 }
 0x1df   :  { %v748_v24 = vsel %vm745_vm3, %v747_v22, %v743_v23  ;;  %v367_v27 = vpop.f32.mrf.mxu3 }
 0x1e0   :  { %v749_v25 = vmul.f32 %v968_v52, %v748_v24  ;;  %v750_v26 = vmul.f32 %v970_v55, %v748_v24 }
 0x1e2   :  { %924 = vmatmul.msk.f32.vlgmr.msrb.gmra.mxu3 %vm266_vm1, %v749_v25  ;;  %925 = vmatmul.msk.f32.vlgmr.msra.gmra.mxu0 %vm266_vm1, %v750_v26 }
 0x24f   :  { %v528_v30 = vpop.f32.mrf.mxu0 }
 0x255   :  { %v501_v29 = vpop.f32.mrf.mxu3 }
 0x256   :  { %805 = vrot.lane.b32.xlu0 %v501_v29, %s1179_s26 }
 0x257   :  { %v664_v32 = vpop.f32.mrf.mxu0 }
 0x25d   :  { %v638_v31 = vpop.f32.mrf.mxu3 }
 0x25e   :  { %807 = vrot.lane.b32.xlu0 %v528_v30, %s1179_s26  ;;  %813 = vrot.lane.b32.xlu1 %v638_v31, %s1189_s8 }
 0x25f   :  { %v800_v34 = vpop.f32.mrf.mxu0 }
 0x265   :  { %v774_v33 = vpop.f32.mrf.mxu3 }
 0x266   :  { %815 = vrot.lane.b32.xlu1 %v664_v32, %s1189_s8  ;;  %821 = vrot.lane.b32.xlu2 %v774_v33, %s1190_s16 }
 0x26e   :  { %823 = vrot.lane.b32.xlu2 %v800_v34, %s1190_s16 }
 0x2c0   :  { %v822_v40 = vpop.permute.xlu2 %821 }
 0x2c8   :  { %v806_v39 = vpop.permute.xlu0 %805  ;;  %v824_v48 = vpop.permute.xlu2 %823 }
 0x2c9   :  { %v827_v41 = vsel %vm266_vm1, %v367_v27, %v806_v39 }
 0x2d0   :  { %v814_v42 = vpop.permute.xlu1 %813  ;;  %v808_v45 = vpop.permute.xlu0 %807 }
 0x2d1   :  { %v830_v43 = vsel %vm829_vm4, %v827_v41, %v814_v42  ;;  %v828_v46 = vsel %vm266_vm1, %v390_v28, %v808_v45 }
 0x2d2   :  { %v833_v44 = vsel %vm832_vm5, %v830_v43, %v822_v40 }
 0x2d3   :  { %926 = vmatmul.msk.f32.vlgmr.msra.gmra.mxu1 %vm162_vm0, %v833_v44 }
 0x2d8   :  { %v816_v47 = vpop.permute.xlu1 %815 }
 0x2d9   :  { %v831_v49 = vsel %vm829_vm4, %v828_v46, %v816_v47 }
 0x2da   :  { %v834_v50 = vsel %vm832_vm5, %v831_v49, %v824_v48 }
 0x2db   :  { %927 = vmatmul.msk.f32.gmra.mxu1 %vm162_vm0, %v834_v50 }
 0x350   :  { %v866_v52 = vpop.f32.mrf.mxu1 }
 0x351   :  { %v867_v53 = vadd.f32 %v950_v51, %v866_v52 }
 0x353   :  { %872 = vst.msk [vmem:[#allocation14] sm:$0xff] %vm162_vm0, %v867_v53 }
 0x358   :  { %v869_v54 = vpop.f32.mrf.mxu1 }
 0x359   :  { %v870_v55 = vadd.f32 %v950_v51, %v869_v54 }
 0x35b   :  { %873 = vst.msk [vmem:[#allocation14 + $0x8] sm:$0xff] %vm162_vm0, %v870_v55 }
 0x35c   :  { %886 = dma.vmem_to_hbm [thread:$0]  %s879_s19, 256, %s881_s21, [#allocation4], %s1178_s25, %s1178_s25, %s1179_s26  }
 0x35d   :  { %1175 = dma.done.wait [#allocation4], 256  }
 0x35e   :  { %1176 = vsyncadd [#allocation4], 4294967040 }
 0x35f   :  { %891 = vsyncpa [#allocation3], 1 }
 0x360   :  { %892 = vsyncpa [#allocation6], 1 }
 0x361   :  { %893 = vsyncpa [#allocation9], 1 }
 0x362   :  { %894 = vsyncpa [#allocation12], 1 }
 0x363   :  { %895 = vsyncpa [#allocation4], 1 }

</bundles_post_ra>
